<compile_context>
chip_gen: v6e
topology: v6e:2x2x1
jax: 0.10.0
libtpu: 0.0.40
codegen_flags: <defaults>
</compile_context>

<pallas_src>
import jax
import jax.numpy as jnp
from jax import lax
from jax.experimental import pallas as pl
from jax.experimental.pallas import tpu as pltpu

BN_EPS = 1e-5
LANES = 128


def _round_up(n, m):
    return ((n + m - 1) // m) * m


def sender_kernel(x_ref, gb_ref, w_ref, o_ref):
    # x_ref:  (B, D)   f32  input activations (D left unpadded)
    # gb_ref: (2, D)   f32  row 0 = gamma, row 1 = beta
    # w_ref:  (D, Op)  f32  Linear weight, transposed; columns zero-padded to Op
    # o_ref:  (B, Op)  f32  output (lane-dense store; caller slices [:, :O])
    x = x_ref[...]                                             # (B, D)
    inv_b = 1.0 / x.shape[0]

    # Single-pass batch statistics (training-mode BatchNorm1d, biased variance).
    mean = jnp.sum(x, axis=0, keepdims=True) * inv_b           # (1, D)
    ex2 = jnp.sum(x * x, axis=0, keepdims=True) * inv_b        # (1, D)
    # Clamp: f32 cancellation can make E[x^2]-mean^2 slightly negative.
    var = jnp.maximum(ex2 - mean * mean, 0.0)                  # (1, D)

    # Fold normalize + affine into one per-feature scale/shift (tiny (1, D) row).
    gamma = gb_ref[0:1, :]                                     # (1, D)
    beta = gb_ref[1:2, :]                                      # (1, D)
    s = gamma * lax.rsqrt(var + BN_EPS)                        # (1, D)  EUP rsqrt
    t = beta - mean * s                                        # (1, D)

    # Full (B, D) slab: fused scale/shift + ReLU.
    y = jnp.maximum(x * s + t, 0.0)

    # Linear (no bias) on the MXU: f32 operands, f32 accumulation.
    o_ref[...] = jnp.dot(y, w_ref[...], preferred_element_type=jnp.float32)


def pack_sender_params(gamma, beta, w_t):
    """One-time parameter packing. Call at init, NOT per forward.

    gamma/beta: (D,), w_t: (D, O) = torch_weight.T
    Returns (gb, wp, O) where gb is (2, D) f32 and wp is (D, Op) f32 with
    Op = round_up(O, 128) (padded columns are exact zeros).
    """
    D, O = w_t.shape
    Op = _round_up(O, LANES)
    gb = jnp.stack(
        [gamma.astype(jnp.float32), beta.astype(jnp.float32)], axis=0)  # (2, D)
    wp = w_t.astype(jnp.float32)
    if Op != O:
        wp = jnp.pad(wp, ((0, 0), (0, Op - O)))
    return gb, wp, O


def sender_forward(x, gb, wp, out_dim):
    """x: (B, D) f32, gb: (2, D), wp: (D, Op) from pack_sender_params."""
    B, D = x.shape
    Op = wp.shape[1]

    # Advisory cost so XLA schedules neighbors around this overhead-bound call.
    cost = pl.CostEstimate(
        flops=2 * B * D * Op + 8 * B * D,
        transcendentals=D,
        bytes_accessed=4 * (B * D + 2 * D + D * Op + B * Op),
    )

    out_p = pl.pallas_call(
        sender_kernel,
        out_shape=jax.ShapeDtypeStruct((B, Op), jnp.float32),
        # No grid: single full-array blocks resident in VMEM, no pipelining
        # machinery and no double-buffering for a one-shot body.
        in_specs=[
            pl.BlockSpec(memory_space=pltpu.MemorySpace.VMEM),
            pl.BlockSpec(memory_space=pltpu.MemorySpace.VMEM),
            pl.BlockSpec(memory_space=pltpu.MemorySpace.VMEM),
        ],
        out_specs=pl.BlockSpec(memory_space=pltpu.MemorySpace.VMEM),
        cost_estimate=cost,
    )(x.astype(jnp.float32), gb, wp)

    # NOTE: for production-scale B, tile B with a grid axis (stats pass +
    # normalize/matmul pass) sized against v7x's 64 MiB VMEM, and mark the
    # batch axis "parallel" to use both v7x TensorCores. At B=8 a single
    # block is optimal and keeps exact full-batch statistics in one kernel.
    return out_p[:, :out_dim]


def sender_reference(x, gamma, beta, w_t):
    # Pure f32 reference matching PyTorch BatchNorm1d(train) -> ReLU -> Linear.
    mean = jnp.mean(x, axis=0, keepdims=True)
    var = jnp.mean((x - mean) ** 2, axis=0, keepdims=True)
    y = (x - mean) / jnp.sqrt(var + BN_EPS) * gamma[None, :] + beta[None, :]
    y = jnp.maximum(y, 0.0)
    return y @ w_t


if __name__ == "__main__":
    # Small shapes consistent with the module: batch of 8 visual feature vectors.
    B = 8                    # batch
    D = 32                   # visual_features_dim
    O = 16                   # output_dim

    key = jax.random.PRNGKey(0)
    kx, kg, kb, kw = jax.random.split(key, 4)

    x = jax.random.normal(kx, (B, D), dtype=jnp.float32)

    # Deterministic synthetic parameters (not a checkpoint load).
    gamma = 1.0 + 0.1 * jax.random.normal(kg, (D,), dtype=jnp.float32)  # BN weight
    beta = 0.1 * jax.random.normal(kb, (D,), dtype=jnp.float32)         # BN bias
    # Linear weight in PyTorch is (O, D); store transposed (D, O) for the kernel.
    bound = 1.0 / jnp.sqrt(D)
    w_t = jax.random.uniform(kw, (D, O), dtype=jnp.float32,
                             minval=-bound, maxval=bound)

    # One-time packing (hoisted out of the per-call path).
    gb, wp, out_dim = pack_sender_params(gamma, beta, w_t)
    gb, wp = jax.block_until_ready((gb, wp))

    fwd = jax.jit(sender_forward, static_argnums=(3,))
    out = jax.block_until_ready(fwd(x, gb, wp, out_dim))
    ref = sender_reference(x, gamma, beta, w_t)

    assert out.shape == (B, O)
    # All-f32 path (MXU with f32 accumulation): tight tolerance.
    assert jnp.allclose(out, ref, atol=1e-4, rtol=1e-4), (
        f"max abs err {jnp.max(jnp.abs(out - ref))}"
    )

    print("KERNEL_OK")
</pallas_src>

<mosaic_0001>
module attributes {stable_mosaic.version = 11 : i64} {
  func.func @sender_kernel(%arg0: memref<8x32xf32, #tpu.memory_space<vmem>>, %arg1: memref<2x32xf32, #tpu.memory_space<vmem>>, %arg2: memref<32x128xf32, #tpu.memory_space<vmem>>, %arg3: memref<8x128xf32, #tpu.memory_space<vmem>>) attributes {dimension_semantics = [], scalar_prefetch = 0 : i64, scratch_operands = 0 : i64, tpu.core_type = #tpu.core_type<tc>} {
    %c0 = arith.constant 0 : index
    %c0_0 = arith.constant 0 : index
    %0 = vector.load %arg0[%c0, %c0_0] : memref<8x32xf32, #tpu.memory_space<vmem>>, vector<8x32xf32>
    %cst = arith.constant dense<0.000000e+00> : vector<32xf32>
    %1 = vector.multi_reduction <add>, %0, %cst [0] : vector<8x32xf32> to vector<32xf32>
    %2 = vector.shape_cast %1 : vector<32xf32> to vector<1x32xf32>
    %cst_1 = arith.constant 1.250000e-01 : f32
    %3 = vector.broadcast %cst_1 : f32 to vector<1x32xf32>
    %4 = arith.mulf %2, %3 : vector<1x32xf32>
    %5 = arith.mulf %0, %0 : vector<8x32xf32>
    %cst_2 = arith.constant dense<0.000000e+00> : vector<32xf32>
    %6 = vector.multi_reduction <add>, %5, %cst_2 [0] : vector<8x32xf32> to vector<32xf32>
    %7 = vector.shape_cast %6 : vector<32xf32> to vector<1x32xf32>
    %cst_3 = arith.constant 1.250000e-01 : f32
    %8 = vector.broadcast %cst_3 : f32 to vector<1x32xf32>
    %9 = arith.mulf %7, %8 : vector<1x32xf32>
    %10 = arith.mulf %4, %4 : vector<1x32xf32>
    %11 = arith.subf %9, %10 : vector<1x32xf32>
    %cst_4 = arith.constant 0.000000e+00 : f32
    %12 = vector.broadcast %cst_4 : f32 to vector<1x32xf32>
    %13 = arith.maximumf %11, %12 : vector<1x32xf32>
    %c0_5 = arith.constant 0 : index
    %c0_6 = arith.constant 0 : index
    %14 = vector.load %arg1[%c0_5, %c0_6] : memref<2x32xf32, #tpu.memory_space<vmem>>, vector<1x32xf32>
    %c1 = arith.constant 1 : index
    %c0_7 = arith.constant 0 : index
    %15 = vector.load %arg1[%c1, %c0_7] : memref<2x32xf32, #tpu.memory_space<vmem>>, vector<1x32xf32>
    %cst_8 = arith.constant 9.99999974E-6 : f32
    %16 = vector.broadcast %cst_8 : f32 to vector<1x32xf32>
    %17 = arith.addf %13, %16 : vector<1x32xf32>
    %18 = math.rsqrt %17 : vector<1x32xf32>
    %19 = arith.mulf %14, %18 : vector<1x32xf32>
    %20 = arith.mulf %4, %19 : vector<1x32xf32>
    %21 = arith.subf %15, %20 : vector<1x32xf32>
    %22 = vector.broadcast %19 : vector<1x32xf32> to vector<8x32xf32>
    %23 = arith.mulf %0, %22 : vector<8x32xf32>
    %24 = vector.broadcast %21 : vector<1x32xf32> to vector<8x32xf32>
    %25 = arith.addf %23, %24 : vector<8x32xf32>
    %cst_9 = arith.constant 0.000000e+00 : f32
    %26 = vector.broadcast %cst_9 : f32 to vector<8x32xf32>
    %27 = arith.maximumf %25, %26 : vector<8x32xf32>
    %c0_10 = arith.constant 0 : index
    %c0_11 = arith.constant 0 : index
    %28 = vector.load %arg2[%c0_10, %c0_11] : memref<32x128xf32, #tpu.memory_space<vmem>>, vector<32x128xf32>
    %cst_12 = arith.constant dense<0.000000e+00> : vector<8x128xf32>
    %29 = tpu.matmul %27, %28, %cst_12 {dimension_numbers = #tpu.dot_dimension_numbers<[1], [0], [0], [1], [0, 0, 1, 1], [], []>} : vector<8x32xf32>, vector<32x128xf32>, vector<8x128xf32> -> vector<8x128xf32>
    %c0_13 = arith.constant 0 : index
    %c0_14 = arith.constant 0 : index
    %30 = vector.load %arg3[%c0_13, %c0_14] : memref<8x128xf32, #tpu.memory_space<vmem>>, vector<8x128xf32>
    tpu.vector_store %arg3[%c0_13, %c0_14], %29 {strides = array<i32>} : memref<8x128xf32, #tpu.memory_space<vmem>>, vector<8x128xf32>,
    return
  }
}

</mosaic_0001>

<bundles_post_ra>
// kernel: sender_forward.1
= control target key start
LH: loop header
LB: loop body
LE: loop exit
PB: predicated region body
PF: predicated region fallthrough
CT: control target
= control target key end

     0   :  { %8 = vsyncpa [#allocation3], 0  ;;  %s342_s0 = inlined_call_operand.hbm [shape: f32[8,32], index: 0, kind: input, shape index: {}]   ;;  %s343_s1 = inlined_call_operand.hbm [shape: f32[2,32], index: 1, kind: input, shape index: {}]   ;;  %s344_s2 = inlined_call_operand.hbm [shape: f32[32,128], index: 2, kind: input, shape index: {}]   ;;  %s345_s3 = inlined_call_operand.hbm [shape: f32[8,128], index: 3, kind: output, shape index: {}]  }
   0x1   :  { %9 = vsyncpa [#allocation6], 0 }
   0x2   :  { %10 = vsyncpa [#allocation4], 0  ;;  %s299_s12 = smov [#allocation5]   ;;  %s300_s14 = smov [#allocation2]  }
   0x3   :  { %s27_s13 = sshll.u32 %s299_s12, 4  ;;  %s17_s15 = sshll.u32 %s300_s14, 4  ;;  %s28_s13 = int_to_ptr.vmem [resolvable:$true] %s27_s13  ;;  %s18_s15 = int_to_ptr.vmem [resolvable:$true] %s17_s15 }
   0x4   :  { %s221_s16 = scalar_lea.vmem %s28_s13, 32  ;;  %p226_p1 = scmp.lt.s32.totalorder %s28_s13, %s28_s13 }
   0x5   :  { %p222_p0 = scmp.ne.s32.totalorder %s28_s13, %s221_s16  ;;  %p227_p2 = scmp.lt.s32.totalorder %s221_s16, %s221_s16 }
   0x7   :  { %p228_p3 = por %p227_p2, %p226_p1 }
   0x9   :  { %p229_p4 = pnand %p228_p3, %p222_p0 }
   0xb   :  { %232 = shalt.err (!%p229_p4)
}
   0xc   :  { %30 = dma.hbm_to_vmem [thread:$0]  %s343_s1, 32, %s28_s13, [#allocation6]  }
   0xd   :  { %s241_s19 = scalar_lea.vmem %s18_s15, 128  ;;  %p246_p6 = scmp.lt.s32.totalorder %s18_s15, %s18_s15 }
   0xe   :  { %p242_p5 = scmp.ne.s32.totalorder %s18_s15, %s241_s19  ;;  %p247_p7 = scmp.lt.s32.totalorder %s241_s19, %s241_s19 }
  0x10   :  { %p248_p8 = por %p247_p7, %p246_p6 }
  0x12   :  { %p249_p9 = pnand %p248_p8, %p242_p5 }
  0x14   :  { %252 = shalt.err (!%p249_p9)
}
  0x15   :  { %20 = dma.hbm_to_vmem [thread:$0]  %s342_s0, 128, %s18_s15, [#allocation3]  }
  0x16   :  { %s301_s22 = smov [#allocation7]  }
  0x17   :  { %s36_s23 = sshll.u32 %s301_s22, 4  ;;  %s37_s23 = int_to_ptr.vmem [resolvable:$true] %s36_s23 }
  0x18   :  { %s261_s24 = scalar_lea.vmem %s37_s23, 512  ;;  %p266_p11 = scmp.lt.s32.totalorder %s37_s23, %s37_s23 }
  0x19   :  { %p262_p10 = scmp.ne.s32.totalorder %s37_s23, %s261_s24  ;;  %p267_p12 = scmp.lt.s32.totalorder %s261_s24, %s261_s24 }
  0x1b   :  { %p268_p13 = por %p267_p12, %p266_p11 }
  0x1d   :  { %p269_p0 = pnand %p268_p13, %p262_p10 }
  0x1f   :  { %272 = shalt.err (!%p269_p0)
}
  0x20   :  { %s302_s1 = smov 128   ;;  %s303_s25 = smov 8  }
  0x21   :  { %42 = dma.hbm_to_vmem [thread:$0]  %s344_s2, 512, %s37_s23, [#allocation6], %s302_s1, %s302_s1, %s303_s25  }
  0x22   :  { %293 = dma.done.wait [#allocation3], 128  }
  0x23   :  { %294 = vsyncadd [#allocation3], 4294967168 }
  0x24   :  { %295 = dma.done.wait [#allocation6], 544  }
  0x25   :  { %296 = vsyncadd [#allocation6], 4294966752  ;;  %v304_v0 = vmov 0.0   ;;  %vm305_vm0 = vmmov 0   ;;  %vm53_vm1 = vcmask 261120   ;;  %v95_v1 = vld [vmem:[#allocation7 + $0x18] sm:$0xff]  ;;  %v81_v27 = vlaneseq }
  0x26   :  { %192 = vmatprep.subr.mxu0 %v304_v0  ;;  %200 = vmatprep.mubr.msk.f32.mxu0 %vm305_vm0, %v304_v0  ;;  %v94_v2 = vld [vmem:[#allocation7 + $0x10] sm:$0xff]  ;;  %v93_v4 = vld [vmem:[#allocation7 + $0x8] sm:$0xff]  ;;  %v92_v8 = vld [vmem:[#allocation7] sm:$0xff]  ;;  %s306_s0 = smov [#allocation8]  }
  0x27   :  { %193 = vmatpush3.msra.mxu0 %v95_v1  ;;  %v52_v3 = vld [vmem:[#allocation2] sm:$0xff]  ;;  %v82_v28 = vshrl.u32 %v81_v27, 7  ;;  %v74_v29 = vld [vmem:[#allocation5] sm:$0x1]  ;;  %v75_v33 = vld [vmem:[#allocation5 + $0x1] sm:$0x1] }
  0x28   :  { %194 = vmatprep.subr.mxu0 %v304_v0  ;;  %v54_v5 = vsel %vm53_vm1, %v52_v3, 0.0  ;;  %v62_v6 = vmul.f32 %v52_v3, %v52_v3  ;;  %s176_s2 = sshll.u32 %s306_s0, 4  ;;  %s177_s2 = int_to_ptr.vmem [resolvable:$true] %s176_s2 }
  0x29   :  { %195 = vmatpush3.msra.mxu0 %v94_v2  ;;  %v55_v7 = vrot.slane %v54_v5, 4  ;;  %v83_v30 = vsub.s32 0, %v82_v28  ;;  %s273_s28 = scalar_lea.vmem %s177_s2, 128  ;;  %p278_p2 = scmp.lt.s32.totalorder %s177_s2, %s177_s2 }
  0x2a   :  { %196 = vmatprep.subr.mxu0 %v304_v0  ;;  %v63_v9 = vsel %vm53_vm1, %v62_v6, 0.0  ;;  %p274_p1 = scmp.ne.s32.totalorder %s177_s2, %s273_s28  ;;  %p279_p3 = scmp.lt.s32.totalorder %s273_s28, %s273_s28 }
  0x2b   :  { %197 = vmatpush3.msra.mxu0 %v93_v4  ;;  %v56_v10 = vadd.f32 %v55_v7, %v54_v5  ;;  %v64_v11 = vrot.slane %v63_v9, 4 }
  0x2c   :  { %198 = vmatprep.subr.mxu0 %v304_v0  ;;  %p280_p4 = por %p279_p3, %p278_p2 }
  0x2d   :  { %199 = vmatpush3.msra.mxu0 %v92_v8  ;;  %v57_v12 = vrot.slane %v56_v10, 2  ;;  %v65_v13 = vadd.f32 %v64_v11, %v63_v9 }
  0x2e   :  { %p281_p5 = pnand %p280_p4, %p274_p1 }
  0x2f   :  { %v58_v14 = vadd.f32 %v57_v12, %v56_v10  ;;  %v66_v15 = vrot.slane %v65_v13, 2 }
  0x31   :  { %v59_v16 = vrot.slane %v58_v14, 1  ;;  %v67_v17 = vadd.f32 %v66_v15, %v65_v13 }
  0x33   :  { %v60_v18 = vadd.f32 %v59_v16, %v58_v14  ;;  %v68_v19 = vrot.slane %v67_v17, 1 }
  0x35   :  { %v61_v20 = vmul.f32 0.125, %v60_v18  ;;  %v69_v21 = vadd.f32 %v68_v19, %v67_v17 }
  0x37   :  { %v70_v22 = vmul.f32 0.125, %v69_v21  ;;  %v71_v23 = vmul.f32 %v61_v20, %v61_v20 }
  0x39   :  { %v72_v24 = vsub.f32 %v70_v22, %v71_v23 }
  0x3b   :  { %v73_v25 = vmax.f32 %v72_v24, 0.0 }
  0x3d   :  { %v76_v26 = vadd.f32 1e-05, %v73_v25 }
  0x3f   :  { %211 = vrsqrt.f32 %v76_v26 }
  0x4c   :  { %v212_v31 = vpop.eup %211 }
  0x4d   :  { %v78_v32 = vmul.f32 %v212_v31, %v74_v29 }
  0x4f   :  { %v79_v34 = vmul.f32 %v78_v32, %v61_v20  ;;  %v84_v35 = vrot.slane %v78_v32, %v83_v30 }
  0x51   :  { %v80_v36 = vsub.f32 %v75_v33, %v79_v34  ;;  %v85_v37 = vmul.f32 %v84_v35, %v52_v3 }
  0x53   :  { %v89_v38 = vrot.slane %v80_v36, %v83_v30 }
  0x55   :  { %v90_v39 = vadd.f32 %v89_v38, %v85_v37 }
  0x57   :  { %v91_v40 = vmax.f32 %v90_v39, 0.0 }
  0x59   :  { %201 = vmatmul.mubr.msk.f32.vlgmr.msra.gmra.mxu0 %vm53_vm1, %v91_v40 }
 0x119   :  { %v165_v41 = vpop.f32.mrf.mxu0 }
 0x11a   :  { %169 = vst [vmem:[#allocation8] sm:$0xff] %v165_v41 }
 0x11b   :  { %v202_v42 = vpop.f32.mrf.mxu0 }
 0x11c   :  { %284 = shalt.err (!%p281_p5)
}
 0x11d   :  { %179 = dma.vmem_to_hbm [thread:$0]  %s177_s2, 128, %s345_s3, [#allocation4]  }
 0x11e   :  { %297 = dma.done.wait [#allocation4], 128  }
 0x11f   :  { %298 = vsyncadd [#allocation4], 4294967168 }
 0x120   :  { %183 = vsyncpa [#allocation3], 1 }
 0x121   :  { %184 = vsyncpa [#allocation6], 1 }
 0x122   :  { %185 = vsyncpa [#allocation4], 1 }

</bundles_post_ra>
